<compile_context>
chip_gen: v7x
topology: tpu7x:2x2x1
jax: 0.10.0
libtpu: 0.0.40
codegen_flags: <defaults>
</compile_context>

<pallas_src>
import functools

import jax
import jax.numpy as jnp
from jax.experimental import pallas as pl
from jax.experimental.pallas import tpu as pltpu

D_IN, D_H1, D_H2, D_OUT = 784, 128, 32, 10
TILE_B = 1024          # sweep 512/1024/2048; 1024 f32 rows = ~3.1 MiB per buffer


def _round_up(n, m):
    return ((n + m - 1) // m) * m


def feedforward_kernel(x_ref, w1_ref, b1_ref, w2_ref, b2_ref, w3_ref, b3_ref,
                       out_ref):
    # x arrives as the original f32 block; cast to bf16 here (VPU work hides
    # under the MXU) instead of a separate wrapper-side pad+cast pass.
    x = x_ref[...].astype(jnp.bfloat16)

    # Layer 1 (dominant): (tile_b, 784)bf16 @ (784, 128)bf16 -> f32 acc.
    h1 = jnp.dot(x, w1_ref[...], preferred_element_type=jnp.float32)
    h1 = jnp.maximum(h1 + b1_ref[...], 0.0)            # bias + ReLU in f32 (VPU)

    # Layer 2: (tile_b, 128) @ (128, 32). bf16 dot inputs, f32 epilogue.
    h2 = jnp.dot(h1.astype(jnp.bfloat16), w2_ref[...],
                 preferred_element_type=jnp.float32)
    h2 = jnp.maximum(h2 + b2_ref[...], 0.0)

    # Layer 3 (no activation): (tile_b, 32) @ (32, 10).
    h3 = jnp.dot(h2.astype(jnp.bfloat16), w3_ref[...],
                 preferred_element_type=jnp.float32)
    out_ref[...] = (h3 + b3_ref[...]).astype(out_ref.dtype)


def prepare_params(params):
    """One-time prep of PyTorch-layout params (hoisted out of the per-call path).

    PyTorch Linear stores weight as (out, in); transpose once, cast MXU inputs
    to bf16, reshape biases to (1, N) f32 for in-kernel broadcast-add.
    """
    return dict(
        w1=params["w1"].T.astype(jnp.bfloat16),             # (784, 128)
        w2=params["w2"].T.astype(jnp.bfloat16),             # (128, 32)
        w3=params["w3"].T.astype(jnp.bfloat16),             # (32, 10)
        b1=params["b1"].reshape(1, -1).astype(jnp.float32),  # (1, 128)
        b2=params["b2"].reshape(1, -1).astype(jnp.float32),  # (1, 32)
        b3=params["b3"].reshape(1, -1).astype(jnp.float32),  # (1, 10)
    )


@functools.partial(jax.jit, static_argnames=("tile_b",))
def feedforward(x, prep, *, tile_b=TILE_B):
    """x: (B, 784) float32. prep: output of prepare_params()."""
    B = x.shape[0]

    # Adaptive tile: don't pad a tiny batch up to the full TILE_B (multiple of
    # 16 keeps bf16 sublane packing clean).
    tile_b = min(tile_b, _round_up(B, 16))
    # Keep >=2 grid steps for medium/large batches: feeds both v7x TensorCores
    # (batch is the only "parallel" axis) and gives the pipeline real overlap.
    if B >= 512 and pl.cdiv(B, tile_b) < 2:
        tile_b = _round_up(pl.cdiv(B, 2), 16)

    b_pad = pl.cdiv(B, tile_b) * tile_b
    n_tiles = b_pad // tile_b
    xp = x if b_pad == B else jnp.pad(x, ((0, b_pad - B), (0, 0)))  # batch-only pad

    w1, w2, w3 = prep["w1"], prep["w2"], prep["w3"]
    b1, b2, b3 = prep["b1"], prep["b2"], prep["b3"]

    resident = lambda shape: pl.BlockSpec(shape, lambda i: (0, 0))

    flops = 2 * b_pad * (D_IN * D_H1 + D_H1 * D_H2 + D_H2 * D_OUT)
    bytes_accessed = (b_pad * D_IN * 4                        # x streamed as f32
                      + (w1.size + w2.size + w3.size) * 2     # bf16 weights
                      + (b1.size + b2.size + b3.size) * 4     # f32 biases
                      + b_pad * D_OUT * 4)                    # f32 output

    # Raise scoped VMEM only when the double-buffered f32 x tile needs it
    # (v5e default is 16 MiB; tile_b >= ~2048 overshoots it).
    vmem_need = 2 * tile_b * (D_IN + D_OUT) * 4 + (1 << 20)
    vmem_limit = (64 << 20) if vmem_need > (12 << 20) else None

    out = pl.pallas_call(
        feedforward_kernel,
        out_shape=jax.ShapeDtypeStruct((b_pad, D_OUT), jnp.float32),
        grid=(n_tiles,),
        in_specs=[
            pl.BlockSpec((tile_b, D_IN), lambda i: (i, 0)),    # x: streamed f32
            resident((D_IN, D_H1)), resident((1, D_H1)),       # w1, b1: resident
            resident((D_H1, D_H2)), resident((1, D_H2)),       # w2, b2: resident
            resident((D_H2, D_OUT)), resident((1, D_OUT)),     # w3, b3: resident
        ],
        out_specs=pl.BlockSpec((tile_b, D_OUT), lambda i: (i, 0)),
        compiler_params=pltpu.CompilerParams(
            dimension_semantics=("parallel",),
            vmem_limit_bytes=vmem_limit),
        cost_estimate=pl.CostEstimate(
            flops=flops, transcendentals=0, bytes_accessed=bytes_accessed),
    )(xp, w1, b1, w2, b2, w3, b3)
    # NOTE: output lane dim (10) is lane-sparse; left as-is (40 B/row writeback).
    return out[:B]


def init_params(key):
    """Deterministic init mimicking nn.Linear's uniform(-1/sqrt(fan_in), ...)."""
    dims = [(D_IN, D_H1), (D_H1, D_H2), (D_H2, D_OUT)]
    params = {}
    for i, (fan_in, fan_out) in enumerate(dims, start=1):
        key, kw, kb = jax.random.split(key, 3)
        bound = 1.0 / jnp.sqrt(fan_in)
        # PyTorch stores weight as (out_features, in_features).
        params[f"w{i}"] = jax.random.uniform(
            kw, (fan_out, fan_in), jnp.float32, -bound, bound)
        params[f"b{i}"] = jax.random.uniform(
            kb, (fan_out,), jnp.float32, -bound, bound)
    return params


def feedforward_ref(x, params):
    """Pure-JAX f32 reference of the PyTorch forward pass."""
    h = jnp.maximum(x @ params["w1"].T + params["b1"], 0.0)
    h = jnp.maximum(h @ params["w2"].T + params["b2"], 0.0)
    return h @ params["w3"].T + params["b3"]


if __name__ == "__main__":
    key = jax.random.PRNGKey(0)
    key, kx = jax.random.split(key)
    params = init_params(key)
    prep = prepare_params(params)          # one-time weight prep (not per-call)

    batch = 8
    x = jax.random.normal(kx, (batch, D_IN), jnp.float32)

    out = feedforward(x, prep)
    out = jax.block_until_ready(out)

    ref = feedforward_ref(x, params)
    assert out.shape == (batch, D_OUT)
    # bf16 MXU inputs (f32 accumulation) -> loosened tolerance vs f32 reference.
    assert jnp.allclose(out, ref, atol=3e-2, rtol=3e-2), "mismatch vs reference"

    print("KERNEL_OK")
</pallas_src>

<mosaic_0001>
module attributes {stable_mosaic.version = 11 : i64} {
  func.func @feedforward_kernel(%arg0: i32, %arg1: memref<16x784xf32, #tpu.memory_space<vmem>>, %arg2: memref<784x128xbf16, #tpu.memory_space<vmem>>, %arg3: memref<1x128xf32, #tpu.memory_space<vmem>>, %arg4: memref<128x32xbf16, #tpu.memory_space<vmem>>, %arg5: memref<1x32xf32, #tpu.memory_space<vmem>>, %arg6: memref<32x10xbf16, #tpu.memory_space<vmem>>, %arg7: memref<1x10xf32, #tpu.memory_space<vmem>>, %arg8: memref<16x10xf32, #tpu.memory_space<vmem>>) attributes {dimension_semantics = [#tpu.dimension_semantics<parallel>], iteration_bounds = array<i64: 1>, scalar_prefetch = 0 : i64, scratch_operands = 0 : i64, tpu.core_type = #tpu.core_type<tc>, window_params = [{transform_indices = @transform_0, window_bounds = array<i64: 16, 784>}, {pipeline_mode = #tpu.pipeline_mode<synchronous>, transform_indices = @transform_1, window_bounds = array<i64: 784, 128>}, {pipeline_mode = #tpu.pipeline_mode<synchronous>, transform_indices = @transform_2, window_bounds = array<i64: 1, 128>}, {pipeline_mode = #tpu.pipeline_mode<synchronous>, transform_indices = @transform_3, window_bounds = array<i64: 128, 32>}, {pipeline_mode = #tpu.pipeline_mode<synchronous>, transform_indices = @transform_4, window_bounds = array<i64: 1, 32>}, {pipeline_mode = #tpu.pipeline_mode<synchronous>, transform_indices = @transform_5, window_bounds = array<i64: 32, 10>}, {pipeline_mode = #tpu.pipeline_mode<synchronous>, transform_indices = @transform_6, window_bounds = array<i64: 1, 10>}, {transform_indices = @transform_7, window_bounds = array<i64: 16, 10>}]} {
    %c0 = arith.constant 0 : index
    %c0_0 = arith.constant 0 : index
    %0 = vector.load %arg1[%c0, %c0_0] : memref<16x784xf32, #tpu.memory_space<vmem>>, vector<16x784xf32>
    %1 = arith.truncf %0 : vector<16x784xf32> to vector<16x784xbf16>
    %c0_1 = arith.constant 0 : index
    %c0_2 = arith.constant 0 : index
    %2 = vector.load %arg2[%c0_1, %c0_2] : memref<784x128xbf16, #tpu.memory_space<vmem>>, vector<784x128xbf16>
    %cst = arith.constant dense<0.000000e+00> : vector<16x128xf32>
    %3 = tpu.matmul %1, %2, %cst {dimension_numbers = #tpu.dot_dimension_numbers<[1], [0], [0], [1], [0, 0, 1, 1], [], []>} : vector<16x784xbf16>, vector<784x128xbf16>, vector<16x128xf32> -> vector<16x128xf32>
    %c0_3 = arith.constant 0 : index
    %c0_4 = arith.constant 0 : index
    %4 = vector.load %arg3[%c0_3, %c0_4] : memref<1x128xf32, #tpu.memory_space<vmem>>, vector<1x128xf32>
    %5 = vector.broadcast %4 : vector<1x128xf32> to vector<16x128xf32>
    %6 = arith.addf %3, %5 : vector<16x128xf32>
    %cst_5 = arith.constant 0.000000e+00 : f32
    %7 = vector.broadcast %cst_5 : f32 to vector<16x128xf32>
    %8 = arith.maximumf %6, %7 : vector<16x128xf32>
    %9 = arith.truncf %8 : vector<16x128xf32> to vector<16x128xbf16>
    %c0_6 = arith.constant 0 : index
    %c0_7 = arith.constant 0 : index
    %10 = vector.load %arg4[%c0_6, %c0_7] : memref<128x32xbf16, #tpu.memory_space<vmem>>, vector<128x32xbf16>
    %cst_8 = arith.constant dense<0.000000e+00> : vector<16x32xf32>
    %11 = tpu.matmul %9, %10, %cst_8 {dimension_numbers = #tpu.dot_dimension_numbers<[1], [0], [0], [1], [0, 0, 1, 1], [], []>} : vector<16x128xbf16>, vector<128x32xbf16>, vector<16x32xf32> -> vector<16x32xf32>
    %c0_9 = arith.constant 0 : index
    %c0_10 = arith.constant 0 : index
    %12 = vector.load %arg5[%c0_9, %c0_10] : memref<1x32xf32, #tpu.memory_space<vmem>>, vector<1x32xf32>
    %13 = vector.broadcast %12 : vector<1x32xf32> to vector<16x32xf32>
    %14 = arith.addf %11, %13 : vector<16x32xf32>
    %cst_11 = arith.constant 0.000000e+00 : f32
    %15 = vector.broadcast %cst_11 : f32 to vector<16x32xf32>
    %16 = arith.maximumf %14, %15 : vector<16x32xf32>
    %17 = arith.truncf %16 : vector<16x32xf32> to vector<16x32xbf16>
    %c0_12 = arith.constant 0 : index
    %c0_13 = arith.constant 0 : index
    %18 = vector.load %arg6[%c0_12, %c0_13] : memref<32x10xbf16, #tpu.memory_space<vmem>>, vector<32x10xbf16>
    %cst_14 = arith.constant dense<0.000000e+00> : vector<16x10xf32>
    %19 = tpu.matmul %17, %18, %cst_14 {dimension_numbers = #tpu.dot_dimension_numbers<[1], [0], [0], [1], [0, 0, 1, 1], [], []>} : vector<16x32xbf16>, vector<32x10xbf16>, vector<16x10xf32> -> vector<16x10xf32>
    %c0_15 = arith.constant 0 : index
    %c0_16 = arith.constant 0 : index
    %20 = vector.load %arg7[%c0_15, %c0_16] : memref<1x10xf32, #tpu.memory_space<vmem>>, vector<1x10xf32>
    %21 = vector.broadcast %20 : vector<1x10xf32> to vector<16x10xf32>
    %22 = arith.addf %19, %21 : vector<16x10xf32>
    %c0_17 = arith.constant 0 : index
    %c0_18 = arith.constant 0 : index
    %23 = vector.load %arg8[%c0_17, %c0_18] : memref<16x10xf32, #tpu.memory_space<vmem>>, vector<16x10xf32>
    tpu.vector_store %arg8[%c0_17, %c0_18], %22 {strides = array<i32>} : memref<16x10xf32, #tpu.memory_space<vmem>>, vector<16x10xf32>,
    return
  }
  func.func @transform_0(%arg0: i32) -> (i32, i32) {
    %c0_i32 = arith.constant 0 : i32
    %c0_i32_0 = arith.constant 0 : i32
    return %arg0, %c0_i32 : i32, i32
  }
  func.func @transform_1(%arg0: i32) -> (i32, i32) {
    %c0_i32 = arith.constant 0 : i32
    %c0_i32_0 = arith.constant 0 : i32
    %c0_i32_1 = arith.constant 0 : i32
    return %c0_i32, %c0_i32_0 : i32, i32
  }
  func.func @transform_2(%arg0: i32) -> (i32, i32) {
    %c0_i32 = arith.constant 0 : i32
    %c0_i32_0 = arith.constant 0 : i32
    %c0_i32_1 = arith.constant 0 : i32
    return %c0_i32, %c0_i32_0 : i32, i32
  }
  func.func @transform_3(%arg0: i32) -> (i32, i32) {
    %c0_i32 = arith.constant 0 : i32
    %c0_i32_0 = arith.constant 0 : i32
    %c0_i32_1 = arith.constant 0 : i32
    return %c0_i32, %c0_i32_0 : i32, i32
  }
  func.func @transform_4(%arg0: i32) -> (i32, i32) {
    %c0_i32 = arith.constant 0 : i32
    %c0_i32_0 = arith.constant 0 : i32
    %c0_i32_1 = arith.constant 0 : i32
    return %c0_i32, %c0_i32_0 : i32, i32
  }
  func.func @transform_5(%arg0: i32) -> (i32, i32) {
    %c0_i32 = arith.constant 0 : i32
    %c0_i32_0 = arith.constant 0 : i32
    %c0_i32_1 = arith.constant 0 : i32
    return %c0_i32, %c0_i32_0 : i32, i32
  }
  func.func @transform_6(%arg0: i32) -> (i32, i32) {
    %c0_i32 = arith.constant 0 : i32
    %c0_i32_0 = arith.constant 0 : i32
    %c0_i32_1 = arith.constant 0 : i32
    return %c0_i32, %c0_i32_0 : i32, i32
  }
  func.func @transform_7(%arg0: i32) -> (i32, i32) {
    %c0_i32 = arith.constant 0 : i32
    %c0_i32_0 = arith.constant 0 : i32
    return %arg0, %c0_i32 : i32, i32
  }
}

</mosaic_0001>

<bundles_post_ra>
// kernel: feedforward.1
= control target key start
LH: loop header
LB: loop body
LE: loop exit
PB: predicated region body
PF: predicated region fallthrough
CT: control target
= control target key end

     0   :  { %12 = vsyncpa [#allocation3], 0  ;;  %s1089_s24 = smov [#allocation2]   ;;  %s1250_s0 = inlined_call_operand.vmem [shape: f32[16,784], index: 0, kind: input, shape index: {}]   ;;  %s1251_s1 = inlined_call_operand.hbm [shape: bf16[784,128], index: 1, kind: input, shape index: {}]   ;;  %s1252_s2 = inlined_call_operand.vmem [shape: f32[1,128], index: 2, kind: input, shape index: {}]   ;;  %s1253_s3 = inlined_call_operand.vmem [shape: bf16[128,32], index: 3, kind: input, shape index: {}]   ;;  %s1254_s4 = inlined_call_operand.vmem [shape: f32[1,32], index: 4, kind: input, shape index: {}]   ;;  %s1255_s5 = inlined_call_operand.vmem [shape: bf16[32,10], index: 5, kind: input, shape index: {}]   ;;  %s1256_s6 = inlined_call_operand.vmem [shape: f32[1,10], index: 6, kind: input, shape index: {}]   ;;  %s1257_s7 = inlined_call_operand.vmem [shape: f32[16,10], index: 7, kind: output, shape index: {}]  }
   0x1   :  { %s20_s25 = sshll.u32 %s1089_s24, 4  ;;  %s1065_s28 = scalar_lea.hbm %s1251_s1, 6272  ;;  %s21_s25 = int_to_ptr.vmem [resolvable:$true] %s20_s25 }
   0x2   :  { %p1066_p0 = scmp.ne.s32.totalorder %s1251_s1, %s1065_s28  ;;  %p1069_p1 = scmp.lt.u32.totalorder %s1065_s28, %s1251_s1 }
   0x4   :  { %p1071_p2 = pnand %p1069_p1, %p1066_p0 }
   0x6   :  { %1074 = shalt.err (!%p1071_p2)
}
   0x7   :  { %s1075_s10 = scalar_lea.vmem %s21_s25, 6272  ;;  %p1080_p4 = scmp.lt.s32.totalorder %s21_s25, %s21_s25 }
   0x8   :  { %p1076_p3 = scmp.ne.s32.totalorder %s21_s25, %s1075_s10  ;;  %p1081_p5 = scmp.lt.s32.totalorder %s1075_s10, %s1075_s10 }
   0xa   :  { %p1082_p6 = por %p1081_p5, %p1080_p4 }
   0xc   :  { %p1083_p7 = pnand %p1082_p6, %p1076_p3 }
   0xe   :  { %1086 = shalt.err (!%p1083_p7)
}
   0xf   :  { %s1090_s11 = smov 64   ;;  %s1091_s12 = smov 4  }
  0x10   :  { %26 = dma.hbm_to_vmem [thread:$0]  %s1251_s1, 6272, %s21_s25, [#allocation3], %s1090_s11, %s1090_s11, %s1091_s12  }
  0x11   :  { %1087 = dma.done.wait [#allocation3], 6272  }
  0x12   :  { %1088 = vsyncadd [#allocation3], 4294961024  ;;  %v1006_v0 = vld [vmem:[#allocation2 + $0x40] sm:$0xff]   ;;  %v1010_v4 = vld [vmem:[#allocation2 + $0x48] sm:$0xff]   ;;  %v1092_v43 = vmov 0.0   ;;  %vm1093_vm0 = vmmov 0  }
  0x13   :  { %v1007_v1 = vld [vmem:[#allocation2] sm:$0xff]   ;;  %887 = vmatprep.subr.bf16.mxu0 %v1006_v0  ;;  %v1011_v5 = vld [vmem:[#allocation2 + $0x8] sm:$0xff]   ;;  %v1014_v8 = vld [vmem:[#allocation2 + $0x50] sm:$0xff]   ;;  %vm461_vm1 = vcmask 130048   ;;  %vm770_vm2 = vcmask 261120   ;;  %vm815_vm3 = vcmask 80896  }
  0x14   :  { %v1008_v2 = vld [vmem:[#allocation2 + $0xc0] sm:$0xff]   ;;  %888 = vmatpush3.bf16.msra.mxu0 %v1007_v1  ;;  %v1012_v6 = vld [vmem:[#allocation2 + $0xc8] sm:$0xff]   ;;  %v1015_v9 = vld [vmem:[#allocation2 + $0x10] sm:$0xff]  }
  0x15   :  { %v1009_v3 = vld [vmem:[#allocation2 + $0x80] sm:$0xff]   ;;  %909 = vmatprep.subr.bf16.mxu1 %v1008_v2  ;;  %889 = vmatprep.subr.bf16.mxu0 %v1010_v4  ;;  %v1013_v7 = vld [vmem:[#allocation2 + $0x88] sm:$0xff]   ;;  %v1016_v10 = vld [vmem:[#allocation2 + $0xd0] sm:$0xff]  }
  0x16   :  { %910 = vmatpush3.bf16.msra.mxu1 %v1009_v3  ;;  %v1017_v11 = vld [vmem:[#allocation2 + $0x90] sm:$0xff]   ;;  %v1018_v12 = vld [vmem:[#allocation2 + $0x58] sm:$0xff]   ;;  %v1022_v16 = vld [vmem:[#allocation2 + $0x60] sm:$0xff]  }
  0x17   :  { %911 = vmatprep.subr.bf16.mxu1 %v1012_v6  ;;  %v1019_v13 = vld [vmem:[#allocation2 + $0x18] sm:$0xff]   ;;  %v1023_v17 = vld [vmem:[#allocation2 + $0x20] sm:$0xff]   ;;  %v1026_v20 = vld [vmem:[#allocation2 + $0x68] sm:$0xff]  }
  0x18   :  { %890 = vmatpush3.bf16.msra.mxu0 %v1011_v5  ;;  %v1020_v14 = vld [vmem:[#allocation2 + $0xd8] sm:$0xff]   ;;  %v1024_v18 = vld [vmem:[#allocation2 + $0xe0] sm:$0xff]   ;;  %v1027_v21 = vld [vmem:[#allocation2 + $0x28] sm:$0xff]  }
  0x19   :  { %891 = vmatprep.subr.bf16.mxu0 %v1014_v8  ;;  %v1021_v15 = vld [vmem:[#allocation2 + $0x98] sm:$0xff]   ;;  %v1025_v19 = vld [vmem:[#allocation2 + $0xa0] sm:$0xff]   ;;  %v1028_v22 = vld [vmem:[#allocation2 + $0xe8] sm:$0xff]  }
  0x1a   :  { %912 = vmatpush3.bf16.msra.mxu1 %v1013_v7  ;;  %v1029_v23 = vld [vmem:[#allocation2 + $0xa8] sm:$0xff]   ;;  %v1030_v24 = vld [vmem:[#allocation2 + $0x70] sm:$0xff]   ;;  %v1034_v28 = vld [vmem:[#allocation2 + $0x78] sm:$0xff]  }
  0x1b   :  { %913 = vmatprep.subr.bf16.mxu1 %v1016_v10  ;;  %v1031_v25 = vld [vmem:[#allocation2 + $0x30] sm:$0xff]   ;;  %v1035_v29 = vld [vmem:[#allocation2 + $0x38] sm:$0xff]   ;;  %v42_v31 = vld [vmem:[%s1250_s0 + $0x8] sm:$0xff] }
  0x1c   :  { %892 = vmatpush3.bf16.msra.mxu0 %v1015_v9  ;;  %v1032_v26 = vld [vmem:[#allocation2 + $0xf0] sm:$0xff]   ;;  %v1036_v30 = vld [vmem:[#allocation2 + $0xf8] sm:$0xff]   ;;  %v49_v32 = vld [vmem:[%s1250_s0 + $0x40] sm:$0xff] }
  0x1d   :  { %893 = vmatprep.subr.bf16.mxu0 %v1018_v12  ;;  %v1033_v27 = vld [vmem:[#allocation2 + $0xb0] sm:$0xff]   ;;  %v56_v33 = vpack.c.bf16 %v49_v32, %v42_v31  ;;  %v1037_v34 = vld [vmem:[#allocation2 + $0xb8] sm:$0xff]   ;;  %v41_v35 = vld [vmem:[%s1250_s0] sm:$0xff] }
  0x1e   :  { %914 = vmatpush3.bf16.msra.mxu1 %v1017_v11  ;;  %v48_v36 = vld [vmem:[%s1250_s0 + $0x38] sm:$0xff]  ;;  %v1038_v38 = vld [vmem:[#allocation2 + $0x140] sm:$0xff]   ;;  %v51_v40 = vld [vmem:[%s1250_s0 + $0x50] sm:$0xff] }
  0x1f   :  { %915 = vmatprep.subr.bf16.mxu1 %v1020_v14  ;;  %497 = vmatprep.mubr.bf16.mxu0 %v56_v33  ;;  %v55_v37 = vpack.c.bf16 %v48_v36, %v41_v35  ;;  %v44_v39 = vld [vmem:[%s1250_s0 + $0x18] sm:$0xff]  ;;  %v1039_v42 = vld [vmem:[#allocation2 + $0x100] sm:$0xff]   ;;  %v43_v44 = vld [vmem:[%s1250_s0 + $0x10] sm:$0xff] }
  0x20   :  { %894 = vmatpush3.bf16.msra.mxu0 %v1019_v13  ;;  %v58_v41 = vpack.c.bf16 %v51_v40, %v44_v39  ;;  %v50_v45 = vld [vmem:[%s1250_s0 + $0x48] sm:$0xff]  ;;  %v1042_v49 = vld [vmem:[#allocation2 + $0x150] sm:$0xff]   ;;  %v1044_v51 = vld [vmem:[#allocation2 + $0x158] sm:$0xff]  }
  0x21   :  { %895 = vmatprep.subr.bf16.mxu0 %v1022_v16  ;;  %v57_v46 = vpack.c.bf16 %v50_v45, %v43_v44  ;;  %v1040_v47 = vld [vmem:[#allocation2 + $0x148] sm:$0xff]   ;;  %v1043_v50 = vld [vmem:[#allocation2 + $0x110] sm:$0xff]   ;;  %v1045_v52 = vld [vmem:[#allocation2 + $0x118] sm:$0xff]  }
  0x22   :  { %916 = vmatpush3.bf16.msra.mxu1 %v1021_v15  ;;  %538 = vmatprep.mubr.bf16.mxu1 %v58_v41  ;;  %v1041_v48 = vld [vmem:[#allocation2 + $0x108] sm:$0xff]   ;;  %v1046_v53 = vld [vmem:[#allocation2 + $0x160] sm:$0xff]   ;;  %v1050_v59 = vld [vmem:[#allocation2 + $0x170] sm:$0xff]  }
  0x23   :  { %917 = vmatprep.subr.bf16.mxu1 %v1024_v18  ;;  %v1047_v54 = vld [vmem:[#allocation2 + $0x120] sm:$0xff]   ;;  %v1048_v55 = vld [vmem:[#allocation2 + $0x168] sm:$0xff]   ;;  %v47_v62 = vld [vmem:[%s1250_s0 + $0x30] sm:$0xff] }
  0x24   :  { %896 = vmatpush3.bf16.msra.mxu0 %v1023_v17  ;;  %v1054_v56 = vld [vmem:[#allocation2 + $0x180] sm:$0xff]   ;;  %v46_v57 = vld [vmem:[%s1250_s0 + $0x28] sm:$0xff]  ;;  %v1051_v1 = vld [vmem:[#allocation2 + $0x130] sm:$0xff]  }
  0x25   :  { %897 = vmatprep.subr.bf16.mxu0 %v1026_v20  ;;  %v1049_v58 = vld [vmem:[#allocation2 + $0x128] sm:$0xff]   ;;  %v53_v60 = vld [vmem:[%s1250_s0 + $0x60] sm:$0xff]  ;;  %v1052_v2 = vld [vmem:[#allocation2 + $0x178] sm:$0xff]  }
  0x26   :  { %918 = vmatpush3.bf16.msra.mxu1 %v1025_v19  ;;  %v60_v61 = vpack.c.bf16 %v53_v60, %v46_v57  ;;  %v54_v63 = vld [vmem:[%s1250_s0 + $0x68] sm:$0xff]  ;;  %v1053_v3 = vld [vmem:[#allocation2 + $0x138] sm:$0xff]   ;;  %v45_v4 = vld [vmem:[%s1250_s0 + $0x20] sm:$0xff] }
  0x27   :  { %919 = vmatprep.subr.bf16.mxu1 %v1028_v22  ;;  %v61_v0 = vpack.c.bf16 %v54_v63, %v47_v62  ;;  %v52_v5 = vld [vmem:[%s1250_s0 + $0x58] sm:$0xff]  ;;  %v1055_v7 = vld [vmem:[%s1253_s3] sm:$0xff]   ;;  %v1056_v8 = vld [vmem:[%s1253_s3 + $0x8] sm:$0xff]  }
  0x28   :  { %898 = vmatpush3.bf16.msra.mxu0 %v1027_v21  ;;  %v59_v6 = vpack.c.bf16 %v52_v5, %v45_v4  ;;  %v1057_v9 = vld [vmem:[%s1253_s3 + $0x10] sm:$0xff]   ;;  %v1058_v10 = vld [vmem:[%s1253_s3 + $0x18] sm:$0xff]   ;;  %v1059_v11 = vld [vmem:[%s1253_s3 + $0x20] sm:$0xff]  }
  0x29   :  { %899 = vmatprep.subr.bf16.mxu0 %v1030_v24  ;;  %v1060_v12 = vld [vmem:[%s1253_s3 + $0x28] sm:$0xff]   ;;  %v1061_v13 = vld [vmem:[%s1253_s3 + $0x30] sm:$0xff]   ;;  %v1062_v14 = vld [vmem:[%s1253_s3 + $0x38] sm:$0xff]  }
  0x2a   :  { %920 = vmatpush3.bf16.msra.mxu1 %v1029_v23  ;;  %v823_v16 = vld [vmem:[%s1252_s2] ss:$0 sm:$0xff] }
  0x2b   :  { %921 = vmatprep.subr.bf16.mxu1 %v1032_v26 }
  0x2c   :  { %900 = vmatpush3.bf16.msra.mxu0 %v1031_v25 }
  0x2d   :  { %901 = vmatprep.subr.bf16.mxu0 %v1034_v28 }
  0x2e   :  { %922 = vmatpush3.bf16.msra.mxu1 %v1033_v27 }
  0x2f   :  { %923 = vmatprep.subr.bf16.mxu1 %v1036_v30 }
  0x30   :  { %902 = vmatpush3.bf16.msra.mxu0 %v1035_v29 }
  0x31   :  { %931 = vmatprep.subr.bf16.mxu0 %v1038_v38 }
  0x32   :  { %924 = vmatpush3.bf16.msra.mxu1 %v1037_v34 }
  0x33   :  { %967 = vmatprep.subr.bf16.mxu1 %v1092_v43  ;;  %498 = vmatmul.mubr.bf16.vlgmr.msra.gmra.mrb[0].mxu0 %v55_v37 }
  0x34   :  { %932 = vmatpush3.bf16.msra.mxu0 %v1039_v42  ;;  %579 = vmatprep.mubr.bf16.mxu0 %v60_v61 }
  0x35   :  { %539 = vmatmul.mubr.bf16.vlgmr.msra.gmra.mrb[0].mxu1 %v57_v46  ;;  %933 = vmatprep.subr.bf16.mxu0 %v1040_v47 }
  0x36   :  { %969 = vmatprep.mubr.msk.bf16.mxu1 %vm1093_vm0, %v1092_v43  ;;  %968 = vmatpush3.bf16.msra.mxu1 %v1054_v56 }
  0x37   :  { %973 = vmatprep.subr.bf16.mxu1 %v1092_v43 }
  0x38   :  { %934 = vmatpush3.bf16.msra.mxu0 %v1041_v48 }
  0x39   :  { %935 = vmatprep.subr.bf16.mxu0 %v1042_v49 }
  0x3c   :  { %936 = vmatpush3.bf16.msra.mxu0 %v1043_v50  ;;  %v1063_v50 = vld [vmem:[%s1255_s5] sm:$0xff]  }
  0x3d   :  { %937 = vmatprep.subr.bf16.mxu0 %v1044_v51  ;;  %970 = vmatmul.mubr.msk.bf16.vlgmr.msra.gmra.mrb[4].mxu1 %vm461_vm1, %v61_v0  ;;  %v1064_v51 = vld [vmem:[%s1255_s5 + $0x8] sm:$0xff]  }
  0x3e   :  { %989 = vmatprep.mubr.msk.bf16.mxu1 %vm1093_vm0, %v1092_v43  ;;  %974 = vmatpush3.bf16.msra.mxu1 %v1055_v7 }
  0x3f   :  { %975 = vmatprep.subr.bf16.mxu1 %v1092_v43 }
  0x40   :  { %938 = vmatpush3.bf16.msra.mxu0 %v1045_v52  ;;  %v874_v52 = vld [vmem:[%s1254_s4] ss:$0 sm:$0xff] }
  0x41   :  { %939 = vmatprep.subr.bf16.mxu0 %v1046_v53 }
  0x42   :  { %976 = vmatpush3.bf16.msra.mxu1 %v1056_v8 }
  0x43   :  { %977 = vmatprep.subr.bf16.mxu1 %v1092_v43 }
  0x44   :  { %940 = vmatpush3.bf16.msra.mxu0 %v1047_v54 }
  0x45   :  { %941 = vmatprep.subr.bf16.mxu0 %v1048_v55 }
  0x46   :  { %978 = vmatpush3.bf16.msra.mxu1 %v1057_v9 }
  0x47   :  { %979 = vmatprep.subr.bf16.mxu1 %v1092_v43 }
  0x48   :  { %942 = vmatpush3.bf16.msra.mxu0 %v1049_v58 }
  0x49   :  { %943 = vmatprep.subr.bf16.mxu0 %v1050_v59 }
  0x4a   :  { %980 = vmatpush3.bf16.msra.mxu1 %v1058_v10 }
  0x4b   :  { %981 = vmatprep.subr.bf16.mxu1 %v1092_v43 }
  0x4c   :  { %944 = vmatpush3.bf16.msra.mxu0 %v1051_v1 }
  0x4d   :  { %945 = vmatprep.subr.bf16.mxu0 %v1052_v2 }
  0x4e   :  { %982 = vmatpush3.bf16.msra.mxu1 %v1059_v11 }
  0x4f   :  { %983 = vmatprep.subr.bf16.mxu1 %v1092_v43 }
  0x50   :  { %946 = vmatpush3.bf16.msra.mxu0 %v1053_v3 }
  0x51   :  { %993 = vmatprep.subr.bf16.mxu0 %v1092_v43 }
  0x52   :  { %984 = vmatpush3.bf16.msra.mxu1 %v1060_v12 }
  0x53   :  { %580 = vmatmul.mubr.bf16.vlgmr.msra.gmra.mrb[4].mxu0 %v59_v6  ;;  %985 = vmatprep.subr.bf16.mxu1 %v1092_v43 }
  0x54   :  { %997 = vmatprep.mubr.msk.bf16.mxu0 %vm1093_vm0, %v1092_v43  ;;  %994 = vmatpush3.bf16.msra.mxu0 %v1063_v50 }
  0x55   :  { %995 = vmatprep.subr.bf16.mxu0 %v1092_v43 }
  0x56   :  { %986 = vmatpush3.bf16.msra.mxu1 %v1061_v13 }
  0x57   :  { %987 = vmatprep.subr.bf16.mxu1 %v1092_v43  ;;  %v883_v43 = vld [vmem:[%s1256_s6] ss:$0 sm:$0xff] }
  0x58   :  { %996 = vmatpush3.bf16.msra.mxu0 %v1064_v51 }
  0x5a   :  { %988 = vmatpush3.bf16.msra.mxu1 %v1062_v14 }
 0x106   :  { %v903_v15 = vpop.f32.mrb[0].mxu0 }
 0x107   :  { %v904_v17 = vpop.f32.mrb[1].mxu0 }
 0x108   :  { %v905_v18 = vadd.f32 %v904_v17, %v903_v15  ;;  %v906_v19 = vpop.f32.mrb[2].mxu0  ;;  %v925_v20 = vpop.f32.mrb[0].mxu1 }
 0x109   :  { %v907_v21 = vpop.f32.mrb[3].mxu0  ;;  %v926_v24 = vpop.f32.mrb[1].mxu1 }
 0x10a   :  { %v500_v22 = vadd.f32 %v905_v18, %v823_v16  ;;  %v908_v23 = vadd.f32 %v907_v21, %v906_v19  ;;  %v927_v25 = vadd.f32 %v926_v24, %v925_v20  ;;  %v928_v26 = vpop.f32.mrb[2].mxu1 }
 0x10b   :  { %v929_v28 = vpop.f32.mrb[3].mxu1 }
 0x10c   :  { %v503_v27 = vadd.f32 %v908_v23, %v823_v16  ;;  %v541_v29 = vadd.f32 %v927_v25, %v500_v22  ;;  %v930_v30 = vadd.f32 %v929_v28, %v928_v26 }
 0x10e   :  { %v544_v31 = vadd.f32 %v930_v30, %v503_v27 }
 0x110   :  { %v622_v32 = vpop.f32.mrb[4].mxu1 }
 0x111   :  { %v971_v33 = vpop.f32.mrb[5].mxu1 }
 0x112   :  { %v625_v34 = vpop.f32.mrb[6].mxu1 }
 0x113   :  { %v972_v35 = vpop.f32.mrb[7].mxu1 }
 0x126   :  { %v947_v36 = vpop.f32.mrb[4].mxu0 }
 0x127   :  { %v948_v37 = vpop.f32.mrb[5].mxu0 }
 0x128   :  { %v949_v38 = vadd.f32 %v948_v37, %v947_v36  ;;  %v950_v39 = vpop.f32.mrb[6].mxu0 }
 0x129   :  { %v951_v40 = vpop.f32.mrb[7].mxu0 }
 0x12a   :  { %v582_v41 = vadd.f32 %v949_v38, %v541_v29  ;;  %v952_v42 = vadd.f32 %v951_v40, %v950_v39 }
 0x12c   :  { %v623_v44 = vadd.f32 %v622_v32, %v582_v41  ;;  %v585_v45 = vadd.f32 %v952_v42, %v544_v31 }
 0x12e   :  { %v626_v46 = vadd.f32 %v625_v34, %v585_v45  ;;  %v629_v47 = vmax.f32 %v623_v44, 0.0 }
 0x130   :  { %v630_v48 = vmax.f32 %v626_v46, 0.0 }
 0x132   :  { %v631_v49 = vpack.c.bf16 %v630_v48, %v629_v47 }
 0x134   :  { %990 = vmatmul.mubr.bf16.vlgmr.msra.gmra.mrb[8].mxu1 %v631_v49 }
 0x207   :  { %v737_v53 = vpop.f32.mrb[8].mxu1 }
 0x208   :  { %v738_v54 = vadd.f32 %v874_v52, %v737_v53  ;;  %v991_v55 = vpop.f32.mrb[9].mxu1 }
 0x209   :  { %v740_v56 = vpop.f32.mrb[10].mxu1 }
 0x20a   :  { %v741_v57 = vadd.f32 %v874_v52, %v740_v56  ;;  %v992_v58 = vpop.f32.mrb[11].mxu1  ;;  %v744_v59 = vmax.f32 %v738_v54, 0.0 }
 0x20c   :  { %v745_v60 = vmax.f32 %v741_v57, 0.0 }
 0x20e   :  { %v746_v61 = vpack.c.bf16 %v745_v60, %v744_v59 }
 0x210   :  { %998 = vmatmul.mubr.msk.bf16.vlgmr.msra.gmra.mrb[8].mxu0 %vm770_vm2, %v746_v61 }
 0x2e3   :  { %v808_v62 = vpop.f32.mrb[8].mxu0 }
 0x2e4   :  { %v809_v63 = vadd.f32 %v883_v43, %v808_v62  ;;  %v999_v0 = vpop.f32.mrb[9].mxu0 }
 0x2e5   :  { %v811_v1 = vpop.f32.mrb[10].mxu0 }
 0x2e6   :  { %816 = vst.msk [vmem:[%s1257_s7] sm:$0xff] %vm815_vm3, %v809_v63  ;;  %v812_v2 = vadd.f32 %v883_v43, %v811_v1  ;;  %v1000_v3 = vpop.f32.mrb[11].mxu0 }
 0x2e8   :  { %817 = vst.msk [vmem:[%s1257_s7 + $0x8] sm:$0xff] %vm815_vm3, %v812_v2 }
 0x2e9   :  { %822 = vsyncpa [#allocation3], 1 }

</bundles_post_ra>
